<compile_context>
chip_gen: v7x
topology: tpu7x:2x2x1
jax: 0.10.0
libtpu: 0.0.40
codegen_flags: <defaults>
</compile_context>

<pallas_src>
import math
from functools import partial

import jax
import jax.numpy as jnp
from jax import lax
from jax.experimental import pallas as pl
from jax.experimental.pallas import tpu as pltpu

_EPS = 1e-5
# Per-block byte budget; 2x(in)+2x(out) double-buffered blocks stay well under
# the smallest default scoped-VMEM limit (16 MiB on v5e).
_VMEM_BLOCK_BUDGET = 3 * 1024 * 1024


def _ibn_tiled_kernel(n_in_tiles, x_ref, g_ref, b_ref, o_ref):
    """One grid step = one channel tile that is purely IN or purely BN."""
    c = pl.program_id(0)
    x = x_ref[...].astype(jnp.float32)      # (N, C_TILE, HW)
    gamma = g_ref[...]                      # (1, C_TILE, 1) float32
    beta = b_ref[...]                       # (1, C_TILE, 1) float32

    @pl.when(c < n_in_tiles)
    def _():
        # InstanceNorm2d(affine=True): stats per (n, c) over spatial.
        mu = jnp.mean(x, axis=-1, keepdims=True)                      # (N, C_TILE, 1)
        var = jnp.mean(x * x, axis=-1, keepdims=True) - mu * mu
        s = gamma * lax.rsqrt(var + _EPS)
        o_ref[...] = (x * s + (beta - mu * s)).astype(o_ref.dtype)

    @pl.when(c >= n_in_tiles)
    def _():
        # BatchNorm2d (training statistics): stats per c over (N, spatial).
        mu = jnp.mean(x, axis=(0, 2), keepdims=True)                  # (1, C_TILE, 1)
        var = jnp.mean(x * x, axis=(0, 2), keepdims=True) - mu * mu
        s = gamma * lax.rsqrt(var + _EPS)
        o_ref[...] = (x * s + (beta - mu * s)).astype(o_ref.dtype)


def _ibn_single_block_kernel(half1, x_ref, ing_ref, inb_ref, bng_ref, bnb_ref, o_ref):
    """Whole-tensor fallback for tiny / non-8-aligned channel counts."""
    x = x_ref[...].astype(jnp.float32)      # (N, C, HW)

    # ---- InstanceNorm half: stats per (n, c) over spatial ----
    x1 = x[:, :half1, :]
    mu1 = jnp.mean(x1, axis=-1, keepdims=True)
    var1 = jnp.mean(x1 * x1, axis=-1, keepdims=True) - mu1 * mu1
    s1 = ing_ref[...] * lax.rsqrt(var1 + _EPS)
    o_ref[:, :half1, :] = (x1 * s1 + (inb_ref[...] - mu1 * s1)).astype(o_ref.dtype)

    # ---- BatchNorm half: stats per c over (batch, spatial) ----
    x2 = x[:, half1:, :]
    mu2 = jnp.mean(x2, axis=(0, 2), keepdims=True)
    var2 = jnp.mean(x2 * x2, axis=(0, 2), keepdims=True) - mu2 * mu2
    s2 = bng_ref[...] * lax.rsqrt(var2 + _EPS)
    o_ref[:, half1:, :] = (x2 * s2 + (bnb_ref[...] - mu2 * s2)).astype(o_ref.dtype)


def _choose_c_tile(half1, half2, n, hw, itemsize):
    """Largest multiple-of-8 channel tile that divides both halves and fits VMEM."""
    g = math.gcd(half1, half2)
    if g % 8 != 0:
        return None  # no aligned tile possible (toy shapes) -> fallback kernel
    max_by_vmem = max(8, _VMEM_BLOCK_BUDGET // max(1, n * hw * itemsize))
    best = 8
    t = 16
    while t <= g:
        if g % t == 0 and t <= max_by_vmem:
            best = t
        t += 8
    return best


def ibn_forward(x_nchw, in_gamma, in_beta, bn_gamma, bn_beta):
    N, C, H, W = x_nchw.shape
    half1 = C // 2
    half2 = C - half1
    HW = H * W

    # Keep the original dtype on the HBM<->VMEM path (math is f32 in-kernel).
    xr = x_nchw.reshape(N, C, HW)
    out_dtype = x_nchw.dtype

    c_tile = _choose_c_tile(half1, half2, N, HW, xr.dtype.itemsize)

    if c_tile is not None:
        # Production path: channel-tiled grid, IN/BN split on a tile boundary.
        gamma = jnp.concatenate([in_gamma, bn_gamma]).astype(jnp.float32).reshape(1, C, 1)
        beta = jnp.concatenate([in_beta, bn_beta]).astype(jnp.float32).reshape(1, C, 1)
        n_in_tiles = half1 // c_tile
        out = pl.pallas_call(
            partial(_ibn_tiled_kernel, n_in_tiles),
            out_shape=jax.ShapeDtypeStruct((N, C, HW), out_dtype),
            grid=(C // c_tile,),
            in_specs=[
                pl.BlockSpec((N, c_tile, HW), lambda c: (0, c, 0)),
                pl.BlockSpec((1, c_tile, 1), lambda c: (0, c, 0)),
                pl.BlockSpec((1, c_tile, 1), lambda c: (0, c, 0)),
            ],
            out_specs=pl.BlockSpec((N, c_tile, HW), lambda c: (0, c, 0)),
            compiler_params=pltpu.CompilerParams(
                dimension_semantics=("parallel",)),
        )(xr, gamma, beta)
    else:
        # Fallback path for toy shapes (e.g. planes=4): single VMEM-resident block.
        ing = in_gamma.reshape(1, half1, 1).astype(jnp.float32)
        inb = in_beta.reshape(1, half1, 1).astype(jnp.float32)
        bng = bn_gamma.reshape(1, half2, 1).astype(jnp.float32)
        bnb = bn_beta.reshape(1, half2, 1).astype(jnp.float32)
        full = lambda shp: pl.BlockSpec(shp, lambda: (0, 0, 0))
        out = pl.pallas_call(
            partial(_ibn_single_block_kernel, half1),
            out_shape=jax.ShapeDtypeStruct((N, C, HW), out_dtype),
            in_specs=[
                full((N, C, HW)),
                full((1, half1, 1)),
                full((1, half1, 1)),
                full((1, half2, 1)),
                full((1, half2, 1)),
            ],
            out_specs=full((N, C, HW)),
        )(xr, ing, inb, bng, bnb)

    return out.reshape(N, C, H, W)


def ibn_reference(x_nchw, in_gamma, in_beta, bn_gamma, bn_beta):
    """Plain-JAX reference for verification."""
    N, C, H, W = x_nchw.shape
    half1 = C // 2
    x1 = x_nchw[:, :half1].astype(jnp.float32)
    x2 = x_nchw[:, half1:].astype(jnp.float32)

    mu1 = jnp.mean(x1, axis=(2, 3), keepdims=True)
    var1 = jnp.mean((x1 - mu1) ** 2, axis=(2, 3), keepdims=True)
    y1 = (x1 - mu1) / jnp.sqrt(var1 + _EPS)
    y1 = y1 * in_gamma[None, :, None, None] + in_beta[None, :, None, None]

    mu2 = jnp.mean(x2, axis=(0, 2, 3), keepdims=True)
    var2 = jnp.mean((x2 - mu2) ** 2, axis=(0, 2, 3), keepdims=True)
    y2 = (x2 - mu2) / jnp.sqrt(var2 + _EPS)
    y2 = y2 * bn_gamma[None, :, None, None] + bn_beta[None, :, None, None]

    return jnp.concatenate([y1, y2], axis=1).astype(x_nchw.dtype)


if __name__ == "__main__":
    # TODO(synk): BatchNorm running_mean/running_var buffer updates (module
    # state) are not modelled; forward uses batch statistics (training mode).

    def run_case(N, C, H, W, key):
        half1 = C // 2
        half2 = C - half1
        kx, kg1, kb1, kg2, kb2 = jax.random.split(key, 5)
        x = jax.random.normal(kx, (N, C, H, W), dtype=jnp.float32)
        in_gamma = 1.0 + 0.1 * jax.random.normal(kg1, (half1,), dtype=jnp.float32)
        in_beta = 0.1 * jax.random.normal(kb1, (half1,), dtype=jnp.float32)
        bn_gamma = 1.0 + 0.1 * jax.random.normal(kg2, (half2,), dtype=jnp.float32)
        bn_beta = 0.1 * jax.random.normal(kb2, (half2,), dtype=jnp.float32)

        out = jax.block_until_ready(
            ibn_forward(x, in_gamma, in_beta, bn_gamma, bn_beta))
        ref = ibn_reference(x, in_gamma, in_beta, bn_gamma, bn_beta)
        assert out.shape == (N, C, H, W)
        assert out.dtype == x.dtype
        assert jnp.allclose(out, ref, atol=2e-4, rtol=2e-4), \
            f"mismatch vs reference at shape {(N, C, H, W)}"

    k1, k2 = jax.random.split(jax.random.PRNGKey(0))
    # Toy shape from the spec (planes=4 -> single-block fallback path).
    run_case(2, 4, 16, 16, k1)
    # Slightly larger channel count to exercise the channel-tiled production path.
    run_case(2, 32, 16, 16, k2)

    print("KERNEL_OK")
</pallas_src>

<mosaic_0001>
module attributes {stable_mosaic.version = 11 : i64} {
  func.func @_ibn_single_block_kernel(%arg0: memref<2x4x256xf32, #tpu.memory_space<vmem>>, %arg1: memref<1x2x1xf32, #tpu.memory_space<vmem>>, %arg2: memref<1x2x1xf32, #tpu.memory_space<vmem>>, %arg3: memref<1x2x1xf32, #tpu.memory_space<vmem>>, %arg4: memref<1x2x1xf32, #tpu.memory_space<vmem>>, %arg5: memref<2x4x256xf32, #tpu.memory_space<vmem>>) attributes {dimension_semantics = [], scalar_prefetch = 0 : i64, scratch_operands = 0 : i64, tpu.core_type = #tpu.core_type<tc>} {
    %c0 = arith.constant 0 : index
    %c0_0 = arith.constant 0 : index
    %c0_1 = arith.constant 0 : index
    %0 = vector.load %arg0[%c0, %c0_0, %c0_1] : memref<2x4x256xf32, #tpu.memory_space<vmem>>, vector<2x4x256xf32>
    %1 = vector.extract_strided_slice %0 {offsets = [0, 0, 0], sizes = [2, 2, 256], strides = [1, 1, 1]} : vector<2x4x256xf32> to vector<2x2x256xf32>
    %cst = arith.constant dense<0.000000e+00> : vector<2x2xf32>
    %2 = vector.multi_reduction <add>, %1, %cst [2] : vector<2x2x256xf32> to vector<2x2xf32>
    %3 = vector.shape_cast %2 : vector<2x2xf32> to vector<2x2x1xf32>
    %cst_2 = arith.constant 2.560000e+02 : f32
    %4 = vector.broadcast %cst_2 : f32 to vector<2x2x1xf32>
    %5 = arith.divf %3, %4 : vector<2x2x1xf32>
    %6 = arith.mulf %1, %1 : vector<2x2x256xf32>
    %cst_3 = arith.constant dense<0.000000e+00> : vector<2x2xf32>
    %7 = vector.multi_reduction <add>, %6, %cst_3 [2] : vector<2x2x256xf32> to vector<2x2xf32>
    %8 = vector.shape_cast %7 : vector<2x2xf32> to vector<2x2x1xf32>
    %cst_4 = arith.constant 2.560000e+02 : f32
    %9 = vector.broadcast %cst_4 : f32 to vector<2x2x1xf32>
    %10 = arith.divf %8, %9 : vector<2x2x1xf32>
    %11 = arith.mulf %5, %5 : vector<2x2x1xf32>
    %12 = arith.subf %10, %11 : vector<2x2x1xf32>
    %c0_5 = arith.constant 0 : index
    %c0_6 = arith.constant 0 : index
    %c0_7 = arith.constant 0 : index
    %13 = vector.load %arg1[%c0_5, %c0_6, %c0_7] : memref<1x2x1xf32, #tpu.memory_space<vmem>>, vector<1x2x1xf32>
    %cst_8 = arith.constant 9.99999974E-6 : f32
    %14 = vector.broadcast %cst_8 : f32 to vector<2x2x1xf32>
    %15 = arith.addf %12, %14 : vector<2x2x1xf32>
    %16 = math.rsqrt %15 : vector<2x2x1xf32>
    %17 = vector.broadcast %13 : vector<1x2x1xf32> to vector<2x2x1xf32>
    %18 = arith.mulf %17, %16 : vector<2x2x1xf32>
    %19 = vector.broadcast %18 : vector<2x2x1xf32> to vector<2x2x256xf32>
    %20 = arith.mulf %1, %19 : vector<2x2x256xf32>
    %c0_9 = arith.constant 0 : index
    %c0_10 = arith.constant 0 : index
    %c0_11 = arith.constant 0 : index
    %21 = vector.load %arg2[%c0_9, %c0_10, %c0_11] : memref<1x2x1xf32, #tpu.memory_space<vmem>>, vector<1x2x1xf32>
    %22 = arith.mulf %5, %18 : vector<2x2x1xf32>
    %23 = vector.broadcast %21 : vector<1x2x1xf32> to vector<2x2x1xf32>
    %24 = arith.subf %23, %22 : vector<2x2x1xf32>
    %25 = vector.broadcast %24 : vector<2x2x1xf32> to vector<2x2x256xf32>
    %26 = arith.addf %20, %25 : vector<2x2x256xf32>
    %c0_12 = arith.constant 0 : index
    %c0_13 = arith.constant 0 : index
    %c0_14 = arith.constant 0 : index
    %27 = vector.load %arg5[%c0_12, %c0_13, %c0_14] : memref<2x4x256xf32, #tpu.memory_space<vmem>>, vector<2x2x256xf32>
    tpu.vector_store %arg5[%c0_12, %c0_13, %c0_14], %26 {strides = array<i32>} : memref<2x4x256xf32, #tpu.memory_space<vmem>>, vector<2x2x256xf32>,
    %28 = vector.extract_strided_slice %0 {offsets = [0, 2, 0], sizes = [2, 2, 256], strides = [1, 1, 1]} : vector<2x4x256xf32> to vector<2x2x256xf32>
    %cst_15 = arith.constant dense<0.000000e+00> : vector<2xf32>
    %29 = vector.multi_reduction <add>, %28, %cst_15 [0, 2] : vector<2x2x256xf32> to vector<2xf32>
    %30 = vector.shape_cast %29 : vector<2xf32> to vector<1x2x1xf32>
    %cst_16 = arith.constant 5.120000e+02 : f32
    %31 = vector.broadcast %cst_16 : f32 to vector<1x2x1xf32>
    %32 = arith.divf %30, %31 : vector<1x2x1xf32>
    %33 = arith.mulf %28, %28 : vector<2x2x256xf32>
    %cst_17 = arith.constant dense<0.000000e+00> : vector<2xf32>
    %34 = vector.multi_reduction <add>, %33, %cst_17 [0, 2] : vector<2x2x256xf32> to vector<2xf32>
    %35 = vector.shape_cast %34 : vector<2xf32> to vector<1x2x1xf32>
    %cst_18 = arith.constant 5.120000e+02 : f32
    %36 = vector.broadcast %cst_18 : f32 to vector<1x2x1xf32>
    %37 = arith.divf %35, %36 : vector<1x2x1xf32>
    %38 = arith.mulf %32, %32 : vector<1x2x1xf32>
    %39 = arith.subf %37, %38 : vector<1x2x1xf32>
    %c0_19 = arith.constant 0 : index
    %c0_20 = arith.constant 0 : index
    %c0_21 = arith.constant 0 : index
    %40 = vector.load %arg3[%c0_19, %c0_20, %c0_21] : memref<1x2x1xf32, #tpu.memory_space<vmem>>, vector<1x2x1xf32>
    %cst_22 = arith.constant 9.99999974E-6 : f32
    %41 = vector.broadcast %cst_22 : f32 to vector<1x2x1xf32>
    %42 = arith.addf %39, %41 : vector<1x2x1xf32>
    %43 = math.rsqrt %42 : vector<1x2x1xf32>
    %44 = arith.mulf %40, %43 : vector<1x2x1xf32>
    %45 = vector.broadcast %44 : vector<1x2x1xf32> to vector<2x2x256xf32>
    %46 = arith.mulf %28, %45 : vector<2x2x256xf32>
    %c0_23 = arith.constant 0 : index
    %c0_24 = arith.constant 0 : index
    %c0_25 = arith.constant 0 : index
    %47 = vector.load %arg4[%c0_23, %c0_24, %c0_25] : memref<1x2x1xf32, #tpu.memory_space<vmem>>, vector<1x2x1xf32>
    %48 = arith.mulf %32, %44 : vector<1x2x1xf32>
    %49 = arith.subf %47, %48 : vector<1x2x1xf32>
    %50 = vector.broadcast %49 : vector<1x2x1xf32> to vector<2x2x256xf32>
    %51 = arith.addf %46, %50 : vector<2x2x256xf32>
    %c0_26 = arith.constant 0 : index
    %c2 = arith.constant 2 : index
    %c0_27 = arith.constant 0 : index
    %52 = vector.load %arg5[%c0_26, %c2, %c0_27] : memref<2x4x256xf32, #tpu.memory_space<vmem>>, vector<2x2x256xf32>
    tpu.vector_store %arg5[%c0_26, %c2, %c0_27], %51 {strides = array<i32>} : memref<2x4x256xf32, #tpu.memory_space<vmem>>, vector<2x2x256xf32>,
    return
  }
}

</mosaic_0001>

<bundles_post_ra>
// kernel: tpu_custom_call.1
= control target key start
LH: loop header
LB: loop body
LE: loop exit
PB: predicated region body
PF: predicated region fallthrough
CT: control target
= control target key end

     0   :  { %10 = vsyncpa [#allocation3], 0  ;;  %s413_s0 = inlined_call_operand.hbm [shape: f32[2,4,256], index: 0, kind: input, shape index: {}]   ;;  %s414_s1 = inlined_call_operand.vmem [shape: f32[1,2,1], index: 1, kind: input, shape index: {}]   ;;  %s415_s2 = inlined_call_operand.vmem [shape: f32[1,2,1], index: 2, kind: input, shape index: {}]   ;;  %s416_s3 = inlined_call_operand.vmem [shape: f32[1,2,1], index: 3, kind: input, shape index: {}]   ;;  %s417_s4 = inlined_call_operand.vmem [shape: f32[1,2,1], index: 4, kind: input, shape index: {}]   ;;  %s418_s5 = inlined_call_operand.hbm [shape: f32[2,4,256], index: 5, kind: output, shape index: {}]  }
   0x1   :  { %11 = vsyncpa [#allocation4], 0  ;;  %s299_s18 = smov [#allocation2]   ;;  %s251_s22 = scalar_lea.hbm %s413_s0, 256 }
   0x2   :  { %s17_s19 = sshll.u32 %s299_s18, 4  ;;  %p252_p0 = scmp.ne.s32.totalorder %s413_s0, %s251_s22  ;;  %s18_s19 = int_to_ptr.vmem [resolvable:$true] %s17_s19 }
   0x3   :  { %p255_p1 = scmp.lt.u32.totalorder %s251_s22, %s413_s0 }
   0x5   :  { %p257_p2 = pnand %p255_p1, %p252_p0 }
   0x7   :  { %260 = shalt.err (!%p257_p2)
}
   0x8   :  { %s261_s27 = scalar_lea.vmem %s18_s19, 256  ;;  %p266_p4 = scmp.lt.s32.totalorder %s18_s19, %s18_s19 }
   0x9   :  { %p262_p3 = scmp.ne.s32.totalorder %s18_s19, %s261_s27  ;;  %p267_p5 = scmp.lt.s32.totalorder %s261_s27, %s261_s27 }
   0xb   :  { %p268_p6 = por %p267_p5, %p266_p4 }
   0xd   :  { %p269_p7 = pnand %p268_p6, %p262_p3 }
   0xf   :  { %272 = shalt.err (!%p269_p7)
}
  0x10   :  { %s300_s28 = smov 128   ;;  %s301_s29 = smov 8  }
  0x11   :  { %23 = dma.hbm_to_vmem [thread:$0]  %s413_s0, 256, %s18_s19, [#allocation3], %s300_s28, %s300_s28, %s301_s29  }
  0x12   :  { %295 = dma.done.wait [#allocation3], 256  }
  0x13   :  { %296 = vsyncadd [#allocation3], 4294967040  ;;  %vm43_vm0 = vcmask 1041408   ;;  %vm147_vm1 = vcmask 1043458   ;;  %v350_v0 = vld [vmem:[#allocation2] sm:$0xff]  ;;  %v352_v1 = vld [vmem:[#allocation2 + $0x8] sm:$0xff] }
  0x14   :  { %v39_v2 = vcombine.high %v350_v0, %v350_v0  ;;  %v44_v3 = vsel %vm43_vm0, %v350_v0, 0.0  ;;  %v40_v4 = vcombine.high %v352_v1, %v352_v1  ;;  %v148_v5 = vsel %vm147_vm1, %v350_v0, 0.0  ;;  %v171_v57 = vld [vmem:[%s416_s3] sm:$0x3] }
  0x15   :  { %v151_v6 = vsel %vm147_vm1, %v352_v1, 0.0  ;;  %v57_v7 = vmul.f32 %v350_v0, %v350_v0  ;;  %v58_v8 = vmul.f32 %v352_v1, %v352_v1  ;;  %v49_v11 = vsel %vm43_vm0, %v352_v1, 0.0  ;;  %v81_v61 = vld [vmem:[%s414_s1] sm:$0x3]  ;;  %s304_s1 = smov [#allocation5]  }
  0x16   :  { %v45_v9 = vsel %vm43_vm0, %v39_v2, 0.0  ;;  %v149_v10 = vsel %vm147_vm1, %v39_v2, 0.0  ;;  %v50_v12 = vsel %vm43_vm0, %v40_v4, 0.0  ;;  %v153_v16 = vsel %vm147_vm1, %v40_v4, 0.0 }
  0x17   :  { %v46_v13 = vadd.f32 %v45_v9, %v44_v3  ;;  %v150_v14 = vadd.f32 %v149_v10, %v148_v5  ;;  %v61_v15 = vcombine.high %v57_v7, %v57_v7  ;;  %v62_v17 = vcombine.high %v58_v8, %v58_v8  ;;  %v193_v9 = vld [vmem:[%s417_s4] sm:$0x3] }
  0x18   :  { %v159_v18 = vsel %vm147_vm1, %v57_v7, 0.0  ;;  %v51_v20 = vadd.f32 %v50_v12, %v49_v11  ;;  %v162_v22 = vsel %vm147_vm1, %v58_v8, 0.0  ;;  %v70_v24 = vsel %vm43_vm0, %v58_v8, 0.0 }
  0x19   :  { %47 = vadd.xlane.f32.xlu1 %v46_v13  ;;  %v152_v19 = vadd.f32 %v151_v6, %v150_v14  ;;  %v160_v21 = vsel %vm147_vm1, %v61_v15, 0.0  ;;  %v71_v25 = vsel %vm43_vm0, %v62_v17, 0.0  ;;  %v164_v27 = vsel %vm147_vm1, %v62_v17, 0.0  ;;  %v114_v6 = vld [vmem:[%s415_s2] sm:$0x3]  ;;  %s223_s2 = sshll.u32 %s304_s1, 4  ;;  %s224_s2 = int_to_ptr.vmem [resolvable:$true] %s223_s2 }
  0x1a   :  { %v161_v23 = vadd.f32 %v160_v21, %v159_v18  ;;  %v72_v29 = vadd.f32 %v71_v25, %v70_v24  ;;  %v65_v31 = vsel %vm43_vm0, %v57_v7, 0.0  ;;  %v66_v32 = vsel %vm43_vm0, %v61_v15, 0.0  ;;  %s273_s4 = scalar_lea.vmem %s224_s2, 256  ;;  %p278_p9 = scmp.lt.s32.totalorder %s224_s2, %s224_s2 }
  0x1b   :  { %v154_v26 = vadd.f32 %v153_v16, %v152_v19  ;;  %v67_v33 = vadd.f32 %v66_v32, %v65_v31  ;;  %v302_v34 = vmov 0   ;;  %v303_v13 = vmov 839922192   ;;  %p274_p8 = scmp.ne.s32.totalorder %s224_s2, %s273_s4  ;;  %p279_p10 = scmp.lt.s32.totalorder %s273_s4, %s273_s4 }
  0x1c   :  { %v163_v28 = vadd.f32 %v162_v22, %v161_v23  ;;  %241 = vset.pattern.permute.xlu0 %v302_v34  ;;  %242 = vset.pattern.permute.xlu1 %v302_v34  ;;  %v97_v14 = vunpack.c.l.s4 %v303_v13  ;;  %v99_v15 = vlaneseq }
  0x1d   :  { %155 = vadd.xlane.f32.xlu0 %v154_v26  ;;  %52 = vadd.xlane.f32.xlu1 %v51_v20  ;;  %p280_p11 = por %p279_p10, %p278_p9 }
  0x1e   :  { %v165_v30 = vadd.f32 %v164_v27, %v163_v28  ;;  %v98_v16 = vunpack.c.0.s8 %v97_v14  ;;  %v100_v17 = vshrl.u32 %v99_v15, 7 }
  0x1f   :  { %p281_p12 = pnand %p280_p11, %p274_p8 }
  0x20   :  { %v101_v19 = vsub.s32 %v98_v16, %v100_v17 }
  0x21   :  { %166 = vadd.xlane.f32.xlu0 %v165_v30  ;;  %73 = vadd.xlane.f32.xlu1 %v72_v29 }
  0x25   :  { %68 = vadd.xlane.f32.xlu0 %v67_v33 }
  0xa6   :  { %v48_v35 = vpop.xlane.xlu1 %47 }
  0xa7   :  { %v55_v40 = vmul.f32 0.00390625, %v48_v35 }
  0xa9   :  { %v77_v49 = vmul.f32 %v55_v40, %v55_v40 }
  0xaa   :  { %v156_v36 = vpop.xlane.xlu0 %155  ;;  %v53_v37 = vpop.xlane.xlu1 %52 }
  0xab   :  { %v158_v38 = vmul.f32 0.001953125, %v156_v36  ;;  %v56_v39 = vmul.f32 0.00390625, %v53_v37 }
  0xad   :  { %v169_v43 = vmul.f32 %v158_v38, %v158_v38  ;;  %v78_v44 = vmul.f32 %v56_v39, %v56_v39 }
  0xae   :  { %v167_v41 = vpop.xlane.xlu0 %166  ;;  %v74_v42 = vpop.xlane.xlu1 %73 }
  0xaf   :  { %v168_v45 = vmul.f32 0.001953125, %v167_v41  ;;  %v76_v46 = vmul.f32 0.00390625, %v74_v42 }
  0xb1   :  { %v170_v47 = vsub.f32 %v168_v45, %v169_v43  ;;  %v80_v51 = vsub.f32 %v76_v46, %v78_v44 }
  0xb2   :  { %v69_v48 = vpop.xlane.xlu0 %68 }
  0xb3   :  { %v172_v50 = vadd.f32 1e-05, %v170_v47  ;;  %v75_v52 = vmul.f32 0.00390625, %v69_v48  ;;  %v83_v54 = vadd.f32 1e-05, %v80_v51 }
  0xb5   :  { %245 = vrsqrt.f32 %v172_v50  ;;  %v79_v53 = vsub.f32 %v75_v52, %v77_v49 }
  0xb7   :  { %v82_v55 = vadd.f32 1e-05, %v79_v53 }
  0xb9   :  { %247 = vrsqrt.f32 %v82_v55 }
  0xba   :  { %249 = vrsqrt.f32 %v83_v54 }
  0xbf   :  { %v246_v56 = vpop.eup %245 }
  0xc0   :  { %v175_v58 = vrot.slane %v246_v56, 2 }
  0xc2   :  { %v177_v59 = vmul.f32 %v175_v58, %v171_v57 }
  0xc3   :  { %v248_v60 = vpop.eup %247 }
  0xc4   :  { %180 = vperm.xlu0 %241, %v177_v59   ;;  %v194_v62 = vrot.slane %v177_v59, 6  ;;  %v86_v63 = vmul.f32 %v248_v60, %v81_v61  ;;  %v250_v2 = vpop.eup %249 }
  0xc5   :  { %v87_v3 = vmul.f32 %v250_v2, %v81_v61 }
  0xc6   :  { %90 = vperm.xlu1 %242, %v86_v63   ;;  %v115_v4 = vmul.f32 %v86_v63, %v55_v40  ;;  %v196_v5 = vmul.f32 %v194_v62, %v158_v38 }
  0xc7   :  { %v116_v11 = vmul.f32 %v87_v3, %v56_v39 }
  0xc8   :  { %v117_v7 = vsub.f32 %v114_v6, %v115_v4  ;;  %v198_v8 = vrot.slane %v196_v5, 2 }
  0xc9   :  { %v118_v12 = vsub.f32 %v114_v6, %v116_v11 }
  0xca   :  { %94 = vperm.xlu1 %242, %v87_v3   ;;  %v200_v10 = vsub.f32 %v193_v9, %v198_v8 }
  0xce   :  { %121 = vperm.xlu1 %242, %v117_v7  }
  0xd2   :  { %203 = vperm.xlu1 %242, %v200_v10  }
  0xd6   :  { %125 = vperm.xlu1 %242, %v118_v12  }
 0x143   :  { %v181_v20 = vpop.permute.xlu0 %180 }
 0x144   :  { %v188_v23 = vrot.slane %v181_v20, %v101_v19 }
 0x145   :  { %v91_v18 = vpop.permute.xlu1 %90 }
 0x146   :  { %v102_v22 = vrot.slane %v91_v18, %v101_v19  ;;  %v189_v27 = vrot.slane %v188_v23, 6 }
 0x148   :  { %v112_v25 = vmul.f32 %v102_v22, %v350_v0  ;;  %v191_v32 = vmul.f32 %v189_v27, %v350_v0  ;;  %v192_v33 = vmul.f32 %v189_v27, %v352_v1 }
 0x149   :  { %v95_v21 = vpop.permute.xlu1 %94 }
 0x14a   :  { %v109_v30 = vrot.slane %v95_v21, %v101_v19 }
 0x14c   :  { %v113_v36 = vmul.f32 %v109_v30, %v352_v1 }
 0x14d   :  { %v122_v24 = vpop.permute.xlu1 %121 }
 0x14e   :  { %v133_v26 = vrot.slane %v122_v24, %v101_v19 }
 0x150   :  { %v143_v28 = vadd.f32 %v133_v26, %v112_v25 }
 0x151   :  { %v204_v29 = vpop.permute.xlu1 %203 }
 0x152   :  { %145 = vst [vmem:[#allocation5] sm:$0x33] %v143_v28  ;;  %v211_v31 = vrot.slane %v204_v29, %v101_v19 }
 0x154   :  { %v212_v34 = vrot.slane %v211_v31, 6 }
 0x155   :  { %v126_v35 = vpop.permute.xlu1 %125 }
 0x156   :  { %v214_v37 = vadd.f32 %v212_v34, %v191_v32  ;;  %v215_v38 = vadd.f32 %v212_v34, %v192_v33  ;;  %v140_v39 = vrot.slane %v126_v35, %v101_v19 }
 0x158   :  { %216 = vst [vmem:[#allocation5] sm:$0xcc] %v214_v37  ;;  %217 = vst [vmem:[#allocation5 + $0x8] sm:$0xcc] %v215_v38  ;;  %v144_v40 = vadd.f32 %v140_v39, %v113_v36 }
 0x15a   :  { %146 = vst [vmem:[#allocation5 + $0x8] sm:$0x33] %v144_v40 }
 0x15b   :  { %284 = shalt.err (!%p281_p12)
}
 0x15c   :  { %s285_s15 = scalar_lea.hbm %s418_s5, 256 }
 0x15d   :  { %p286_p13 = scmp.ne.s32.totalorder %s418_s5, %s285_s15  ;;  %p289_p0 = scmp.lt.u32.totalorder %s285_s15, %s418_s5 }
 0x15f   :  { %p291_p1 = pnand %p289_p0, %p286_p13 }
 0x161   :  { %294 = shalt.err (!%p291_p1)
}
 0x162   :  { %229 = dma.vmem_to_hbm [thread:$0]  %s224_s2, 256, %s418_s5, [#allocation4], %s300_s28, %s300_s28, %s301_s29  }
 0x163   :  { %297 = dma.done.wait [#allocation4], 256  }
 0x164   :  { %298 = vsyncadd [#allocation4], 4294967040 }
 0x165   :  { %233 = vsyncpa [#allocation3], 1 }
 0x166   :  { %234 = vsyncpa [#allocation4], 1 }

</bundles_post_ra>
